<compile_context>
chip_gen: v7x
topology: tpu7x:2x2x1
jax: 0.10.0
libtpu: 0.0.40
codegen_flags: <defaults>
</compile_context>

<pallas_src>
import functools

import numpy as np
import jax
import jax.numpy as jnp
from jax.experimental import pallas as pl
from jax.experimental.pallas import tpu as pltpu  # noqa: F401  (TPU backend)

_K, _STRIDE, _PAD = 3, 2, 1


def _conv_out(sz):
    return (sz + 2 * _PAD - _K) // _STRIDE + 1


# ----------------------------------------------------------------------------
# Host-side (numpy, shape-only) im2col index map for the fused conv1->conv2
# path.  Row r = t2*(P2*N) + p2*N + b selects the conv1 OUTPUT position that
# conv2 tap t2 reads at conv2 output position p2 for batch b; that row's
# 9*Cin columns are conv1's own im2col taps of the raw input (zero-slot index
# for conv1 padding).  Rows whose conv1 position falls in conv2's padding are
# all-zero and get mask=0 so they are forced to exactly 0 after conv1's ReLU.
# ----------------------------------------------------------------------------
def _build_expanded_im2col(n, c_in, h, w):
    h1, w1 = _conv_out(h), _conv_out(w)
    h2, w2 = _conv_out(h1), _conv_out(w1)
    p2 = h2 * w2
    rows = _K * _K * p2 * n
    cols = _K * _K * c_in
    zero_slot = n * c_in * h * w                      # extra zero appended to x
    idx = np.full((rows, cols), zero_slot, np.int32)
    mask = np.zeros((rows, 1), np.float32)
    for kh2 in range(_K):
        for kw2 in range(_K):
            t2 = kh2 * _K + kw2
            for oy2 in range(h2):
                for ox2 in range(w2):
                    pp = oy2 * w2 + ox2
                    iy1 = _STRIDE * oy2 + kh2 - _PAD
                    ix1 = _STRIDE * ox2 + kw2 - _PAD
                    if not (0 <= iy1 < h1 and 0 <= ix1 < w1):
                        continue                      # conv2 padding row
                    for b in range(n):
                        r = t2 * (p2 * n) + pp * n + b
                        mask[r, 0] = 1.0
                        for kh1 in range(_K):
                            for kw1 in range(_K):
                                iy0 = _STRIDE * iy1 + kh1 - _PAD
                                ix0 = _STRIDE * ix1 + kw1 - _PAD
                                if 0 <= iy0 < h and 0 <= ix0 < w:
                                    t1 = kh1 * _K + kw1
                                    for c in range(c_in):
                                        idx[r, t1 * c_in + c] = (
                                            (b * c_in + c) * h + iy0) * w + ix0
    return idx, mask, (h1, w1, h2, w2)


# ----------------------------------------------------------------------------
# Single fused Pallas kernel: conv1+ReLU -> conv2+ReLU -> enc Linear+ReLU -> head
# Four matmuls total; everything else is bias/ReLU/mask and static concats.
# ----------------------------------------------------------------------------
def _rnd_fused_kernel(xcol_ref, mask_ref, w1_ref, b1_ref, w2_ref, b2_ref,
                      we_ref, be_ref, wh_ref, bh_ref, o_ref,
                      *, n_batch, p2, taps):
    f32, bf16 = jnp.float32, jnp.bfloat16
    rows2 = n_batch * p2

    # ---- conv1 + ReLU: ONE matmul, K = 9*Cin.  Rows pre-expanded to conv2's
    #      (tap, p2, batch) order; mask zeroes conv2-padding rows post-ReLU. ----
    h1 = jnp.dot(xcol_ref[...], w1_ref[...], preferred_element_type=f32)
    h1 = (jnp.maximum(h1 + b1_ref[...], 0.0) * mask_ref[...]).astype(bf16)

    # ---- conv2 + ReLU: ONE matmul, K = 9*C1.  Its im2col is a lane-concat of
    #      9 contiguous 32-row (tile-aligned) blocks of h1 -> [rows2, 9*C1]. ----
    col2 = jnp.concatenate(
        [h1[t * rows2:(t + 1) * rows2, :] for t in range(taps)], axis=1)
    h2 = jnp.dot(col2, w2_ref[...], preferred_element_type=f32)
    h2 = jnp.maximum(h2 + b2_ref[...], 0.0).astype(bf16)        # rows = (p2, n)

    # ---- encoder Linear + ReLU: flatten folded into ONE matmul, K = P2*C2. ----
    # (At production batch sizes these N-row blocks become sublane-tile aligned.)
    enc_in = jnp.concatenate(
        [h2[p * n_batch:(p + 1) * n_batch, :] for p in range(p2)], axis=1)
    enc = jnp.dot(enc_in, we_ref[...], preferred_element_type=f32)
    enc = jnp.maximum(enc + be_ref[...], 0.0).astype(bf16)       # [N, E]

    # ---- RND head Linear (no activation); output padded to 128 lanes. ----
    out = jnp.dot(enc, wh_ref[...], preferred_element_type=f32) + bh_ref[...]
    o_ref[...] = out.astype(o_ref.dtype)


def rnd_net_forward(packed, x, *, feature_dim):
    """x: [N, C, H, W] f32 (PyTorch layout) -> [N, feature_dim] f32."""
    n = x.shape[0]
    # Only XLA-side work: one tiny static gather (host im2col) + bf16 cast.
    xflat = jnp.concatenate([x.reshape(-1), jnp.zeros((1,), x.dtype)])
    x_col = xflat[packed["im2col_idx"]].astype(jnp.bfloat16)     # [9*P2*N, 9*Cin]

    c2 = packed["conv2_b"].shape[1]
    p2 = packed["enc_w"].shape[0] // c2
    out_pad = packed["head_w"].shape[1]

    operands = (x_col, packed["mask"],
                packed["conv1_w"], packed["conv1_b"],
                packed["conv2_w"], packed["conv2_b"],
                packed["enc_w"], packed["enc_b"],
                packed["head_w"], packed["head_b"])

    def _full_spec(arr):
        nd = arr.ndim
        return pl.BlockSpec(arr.shape, lambda *_: (0,) * nd)

    out = pl.pallas_call(
        functools.partial(_rnd_fused_kernel, n_batch=n, p2=p2, taps=_K * _K),
        out_shape=jax.ShapeDtypeStruct((n, out_pad), jnp.float32),
        in_specs=[_full_spec(a) for a in operands],
        out_specs=pl.BlockSpec((n, out_pad), lambda *_: (0, 0)),
    )(*operands)
    return out[:, :feature_dim]


# ----------------------------------------------------------------------------
# Parameter handling: raw params in PyTorch layout, packed once for the kernel.
# (Packing bakes in batch & spatial size: re-pack if those change.)
# ----------------------------------------------------------------------------
def init_raw_params(key, *, in_channels, hidden_channels, enc_linear_dim,
                    feature_dim, flat_dim):
    ks = jax.random.split(key, 8)

    def _w(k, shape, fan_in):
        return jax.random.normal(k, shape, jnp.float32) / jnp.sqrt(fan_in)

    return {
        "conv1_w": _w(ks[0], (hidden_channels, in_channels, 3, 3), in_channels * 9),
        "conv1_b": 0.1 * jax.random.normal(ks[1], (hidden_channels,), jnp.float32),
        "conv2_w": _w(ks[2], (hidden_channels, hidden_channels, 3, 3),
                      hidden_channels * 9),
        "conv2_b": 0.1 * jax.random.normal(ks[3], (hidden_channels,), jnp.float32),
        "enc_w": _w(ks[4], (enc_linear_dim, flat_dim), flat_dim),
        "enc_b": 0.1 * jax.random.normal(ks[5], (enc_linear_dim,), jnp.float32),
        "head_w": _w(ks[6], (feature_dim, enc_linear_dim), enc_linear_dim),
        "head_b": 0.1 * jax.random.normal(ks[7], (feature_dim,), jnp.float32),
    }


def pack_params(raw, *, n_batch, in_channels, spatial, lane_pad=128):
    c_in, h, w = in_channels, spatial, spatial
    c1 = raw["conv1_w"].shape[0]
    c2 = raw["conv2_w"].shape[0]
    e_dim = raw["enc_w"].shape[0]
    f_dim = raw["head_w"].shape[0]
    bf16 = jnp.bfloat16

    idx, mask, (_, _, h2, w2) = _build_expanded_im2col(n_batch, c_in, h, w)
    p2 = h2 * w2

    # conv weights: [Cout, Cin, kh, kw] -> [(kh*3+kw)*Cin + cin, Cout]
    conv1_w = np.transpose(np.asarray(raw["conv1_w"]), (2, 3, 1, 0)).reshape(9 * c_in, c1)
    conv2_w = np.transpose(np.asarray(raw["conv2_w"]), (2, 3, 1, 0)).reshape(9 * c1, c2)
    # encoder weight: PyTorch flatten order (c2, p2) -> kernel lane order (p2, c2)
    enc_w = (np.asarray(raw["enc_w"]).reshape(e_dim, c2, p2)
             .transpose(2, 1, 0).reshape(p2 * c2, e_dim))
    # head weight/bias padded to a full 128-lane output store
    out_pad = max(lane_pad, f_dim)
    head_w = np.zeros((e_dim, out_pad), np.float32)
    head_w[:, :f_dim] = np.asarray(raw["head_w"]).T
    head_b = np.zeros((1, out_pad), np.float32)
    head_b[0, :f_dim] = np.asarray(raw["head_b"])

    return {
        "im2col_idx": jnp.asarray(idx),
        "mask": jnp.asarray(mask),
        "conv1_w": jnp.asarray(conv1_w, bf16),
        "conv1_b": jnp.asarray(np.asarray(raw["conv1_b"]).reshape(1, c1), jnp.float32),
        "conv2_w": jnp.asarray(conv2_w, bf16),
        "conv2_b": jnp.asarray(np.asarray(raw["conv2_b"]).reshape(1, c2), jnp.float32),
        "enc_w": jnp.asarray(enc_w, bf16),
        "enc_b": jnp.asarray(np.asarray(raw["enc_b"]).reshape(1, e_dim), jnp.float32),
        "head_w": jnp.asarray(head_w, bf16),
        "head_b": jnp.asarray(head_b, jnp.float32),
    }


# ----------------------------------------------------------------------------
# Pure-JAX f32 reference (PyTorch semantics) for a structural correctness check.
# ----------------------------------------------------------------------------
def reference_forward(raw, x):
    def conv(h, w_, b_):
        y = jax.lax.conv_general_dilated(
            h, w_, window_strides=(2, 2), padding=((1, 1), (1, 1)),
            dimension_numbers=("NCHW", "OIHW", "NCHW"))
        return jax.nn.relu(y + b_[None, :, None, None])

    h = conv(x, raw["conv1_w"], raw["conv1_b"])
    h = conv(h, raw["conv2_w"], raw["conv2_b"])
    h = h.reshape(h.shape[0], -1)                      # NCHW flatten(1)
    h = jax.nn.relu(h @ raw["enc_w"].T + raw["enc_b"])
    return h @ raw["head_w"].T + raw["head_b"]


if __name__ == "__main__":
    # small shapes: batch=2, channels=4, spatial=16
    batch, in_ch, hw = 2, 4, 16
    hidden_channels = 8          # config.grd_hidden_channels
    enc_linear_dim = 32          # config.grd_encoder_linear_dims[-1]
    feature_dim = 32             # RND feature_dim
    flat_dim = hidden_channels * (hw // 4) * (hw // 4)   # 16 -> 8 -> 4 spatial

    key = jax.random.PRNGKey(0)
    k_x, k_p = jax.random.split(key)
    x = jax.random.normal(k_x, (batch, in_ch, hw, hw), jnp.float32)

    raw = init_raw_params(k_p, in_channels=in_ch, hidden_channels=hidden_channels,
                          enc_linear_dim=enc_linear_dim, feature_dim=feature_dim,
                          flat_dim=flat_dim)
    packed = pack_params(raw, n_batch=batch, in_channels=in_ch, spatial=hw)

    fwd = jax.jit(functools.partial(rnd_net_forward, feature_dim=feature_dim))
    out = fwd(packed, x)
    jax.block_until_ready(out)

    assert out.shape == (batch, feature_dim), out.shape
    assert out.dtype == jnp.float32

    # structural correctness vs. f32 reference (bf16 MXU operands -> loose tol)
    ref = reference_forward(raw, x)
    np.testing.assert_allclose(np.asarray(out), np.asarray(ref), rtol=0.1, atol=0.1)

    print("KERNEL_OK")
</pallas_src>

<mosaic_0001>
module attributes {stable_mosaic.version = 11 : i64} {
  func.func @_rnd_fused_kernel(%arg0: memref<288x36xbf16, #tpu.memory_space<vmem>>, %arg1: memref<288x1xf32, #tpu.memory_space<vmem>>, %arg2: memref<36x8xbf16, #tpu.memory_space<vmem>>, %arg3: memref<1x8xf32, #tpu.memory_space<vmem>>, %arg4: memref<72x8xbf16, #tpu.memory_space<vmem>>, %arg5: memref<1x8xf32, #tpu.memory_space<vmem>>, %arg6: memref<128x32xbf16, #tpu.memory_space<vmem>>, %arg7: memref<1x32xf32, #tpu.memory_space<vmem>>, %arg8: memref<32x128xbf16, #tpu.memory_space<vmem>>, %arg9: memref<1x128xf32, #tpu.memory_space<vmem>>, %arg10: memref<2x128xf32, #tpu.memory_space<vmem>>) attributes {dimension_semantics = [], scalar_prefetch = 0 : i64, scratch_operands = 0 : i64, tpu.core_type = #tpu.core_type<tc>} {
    %c0 = arith.constant 0 : index
    %c0_0 = arith.constant 0 : index
    %0 = vector.load %arg0[%c0, %c0_0] : memref<288x36xbf16, #tpu.memory_space<vmem>>, vector<288x36xbf16>
    %c0_1 = arith.constant 0 : index
    %c0_2 = arith.constant 0 : index
    %1 = vector.load %arg2[%c0_1, %c0_2] : memref<36x8xbf16, #tpu.memory_space<vmem>>, vector<36x8xbf16>
    %cst = arith.constant dense<0.000000e+00> : vector<288x8xf32>
    %2 = tpu.matmul %0, %1, %cst {dimension_numbers = #tpu.dot_dimension_numbers<[1], [0], [0], [1], [0, 0, 1, 1], [], []>} : vector<288x36xbf16>, vector<36x8xbf16>, vector<288x8xf32> -> vector<288x8xf32>
    %c0_3 = arith.constant 0 : index
    %c0_4 = arith.constant 0 : index
    %3 = vector.load %arg3[%c0_3, %c0_4] : memref<1x8xf32, #tpu.memory_space<vmem>>, vector<1x8xf32>
    %4 = vector.broadcast %3 : vector<1x8xf32> to vector<288x8xf32>
    %5 = arith.addf %2, %4 : vector<288x8xf32>
    %cst_5 = arith.constant 0.000000e+00 : f32
    %6 = vector.broadcast %cst_5 : f32 to vector<288x8xf32>
    %7 = arith.maximumf %5, %6 : vector<288x8xf32>
    %c0_6 = arith.constant 0 : index
    %c0_7 = arith.constant 0 : index
    %8 = vector.load %arg1[%c0_6, %c0_7] : memref<288x1xf32, #tpu.memory_space<vmem>>, vector<288x1xf32>
    %9 = vector.broadcast %8 : vector<288x1xf32> to vector<288x8xf32>
    %10 = arith.mulf %7, %9 : vector<288x8xf32>
    %11 = arith.truncf %10 : vector<288x8xf32> to vector<288x8xbf16>
    %12 = vector.extract_strided_slice %11 {offsets = [0, 0], sizes = [32, 8], strides = [1, 1]} : vector<288x8xbf16> to vector<32x8xbf16>
    %13 = vector.extract_strided_slice %11 {offsets = [32, 0], sizes = [32, 8], strides = [1, 1]} : vector<288x8xbf16> to vector<32x8xbf16>
    %14 = vector.extract_strided_slice %11 {offsets = [64, 0], sizes = [32, 8], strides = [1, 1]} : vector<288x8xbf16> to vector<32x8xbf16>
    %15 = vector.extract_strided_slice %11 {offsets = [96, 0], sizes = [32, 8], strides = [1, 1]} : vector<288x8xbf16> to vector<32x8xbf16>
    %16 = vector.extract_strided_slice %11 {offsets = [128, 0], sizes = [32, 8], strides = [1, 1]} : vector<288x8xbf16> to vector<32x8xbf16>
    %17 = vector.extract_strided_slice %11 {offsets = [160, 0], sizes = [32, 8], strides = [1, 1]} : vector<288x8xbf16> to vector<32x8xbf16>
    %18 = vector.extract_strided_slice %11 {offsets = [192, 0], sizes = [32, 8], strides = [1, 1]} : vector<288x8xbf16> to vector<32x8xbf16>
    %19 = vector.extract_strided_slice %11 {offsets = [224, 0], sizes = [32, 8], strides = [1, 1]} : vector<288x8xbf16> to vector<32x8xbf16>
    %20 = vector.extract_strided_slice %11 {offsets = [256, 0], sizes = [32, 8], strides = [1, 1]} : vector<288x8xbf16> to vector<32x8xbf16>
    %21 = tpu.concatenate %12, %13, %14, %15, %16, %17, %18, %19, %20 in 1 : vector<32x8xbf16>, vector<32x8xbf16>, vector<32x8xbf16>, vector<32x8xbf16>, vector<32x8xbf16>, vector<32x8xbf16>, vector<32x8xbf16>, vector<32x8xbf16>, vector<32x8xbf16> -> vector<32x72xbf16>
    %c0_8 = arith.constant 0 : index
    %c0_9 = arith.constant 0 : index
    %22 = vector.load %arg4[%c0_8, %c0_9] : memref<72x8xbf16, #tpu.memory_space<vmem>>, vector<72x8xbf16>
    %cst_10 = arith.constant dense<0.000000e+00> : vector<32x8xf32>
    %23 = tpu.matmul %21, %22, %cst_10 {dimension_numbers = #tpu.dot_dimension_numbers<[1], [0], [0], [1], [0, 0, 1, 1], [], []>} : vector<32x72xbf16>, vector<72x8xbf16>, vector<32x8xf32> -> vector<32x8xf32>
    %c0_11 = arith.constant 0 : index
    %c0_12 = arith.constant 0 : index
    %24 = vector.load %arg5[%c0_11, %c0_12] : memref<1x8xf32, #tpu.memory_space<vmem>>, vector<1x8xf32>
    %25 = vector.broadcast %24 : vector<1x8xf32> to vector<32x8xf32>
    %26 = arith.addf %23, %25 : vector<32x8xf32>
    %cst_13 = arith.constant 0.000000e+00 : f32
    %27 = vector.broadcast %cst_13 : f32 to vector<32x8xf32>
    %28 = arith.maximumf %26, %27 : vector<32x8xf32>
    %29 = arith.truncf %28 : vector<32x8xf32> to vector<32x8xbf16>
    %30 = vector.extract_strided_slice %29 {offsets = [0, 0], sizes = [2, 8], strides = [1, 1]} : vector<32x8xbf16> to vector<2x8xbf16>
    %31 = vector.extract_strided_slice %29 {offsets = [2, 0], sizes = [2, 8], strides = [1, 1]} : vector<32x8xbf16> to vector<2x8xbf16>
    %32 = vector.extract_strided_slice %29 {offsets = [4, 0], sizes = [2, 8], strides = [1, 1]} : vector<32x8xbf16> to vector<2x8xbf16>
    %33 = vector.extract_strided_slice %29 {offsets = [6, 0], sizes = [2, 8], strides = [1, 1]} : vector<32x8xbf16> to vector<2x8xbf16>
    %34 = vector.extract_strided_slice %29 {offsets = [8, 0], sizes = [2, 8], strides = [1, 1]} : vector<32x8xbf16> to vector<2x8xbf16>
    %35 = vector.extract_strided_slice %29 {offsets = [10, 0], sizes = [2, 8], strides = [1, 1]} : vector<32x8xbf16> to vector<2x8xbf16>
    %36 = vector.extract_strided_slice %29 {offsets = [12, 0], sizes = [2, 8], strides = [1, 1]} : vector<32x8xbf16> to vector<2x8xbf16>
    %37 = vector.extract_strided_slice %29 {offsets = [14, 0], sizes = [2, 8], strides = [1, 1]} : vector<32x8xbf16> to vector<2x8xbf16>
    %38 = vector.extract_strided_slice %29 {offsets = [16, 0], sizes = [2, 8], strides = [1, 1]} : vector<32x8xbf16> to vector<2x8xbf16>
    %39 = vector.extract_strided_slice %29 {offsets = [18, 0], sizes = [2, 8], strides = [1, 1]} : vector<32x8xbf16> to vector<2x8xbf16>
    %40 = vector.extract_strided_slice %29 {offsets = [20, 0], sizes = [2, 8], strides = [1, 1]} : vector<32x8xbf16> to vector<2x8xbf16>
    %41 = vector.extract_strided_slice %29 {offsets = [22, 0], sizes = [2, 8], strides = [1, 1]} : vector<32x8xbf16> to vector<2x8xbf16>
    %42 = vector.extract_strided_slice %29 {offsets = [24, 0], sizes = [2, 8], strides = [1, 1]} : vector<32x8xbf16> to vector<2x8xbf16>
    %43 = vector.extract_strided_slice %29 {offsets = [26, 0], sizes = [2, 8], strides = [1, 1]} : vector<32x8xbf16> to vector<2x8xbf16>
    %44 = vector.extract_strided_slice %29 {offsets = [28, 0], sizes = [2, 8], strides = [1, 1]} : vector<32x8xbf16> to vector<2x8xbf16>
    %45 = vector.extract_strided_slice %29 {offsets = [30, 0], sizes = [2, 8], strides = [1, 1]} : vector<32x8xbf16> to vector<2x8xbf16>
    %46 = tpu.concatenate %30, %31, %32, %33, %34, %35, %36, %37, %38, %39, %40, %41, %42, %43, %44, %45 in 1 : vector<2x8xbf16>, vector<2x8xbf16>, vector<2x8xbf16>, vector<2x8xbf16>, vector<2x8xbf16>, vector<2x8xbf16>, vector<2x8xbf16>, vector<2x8xbf16>, vector<2x8xbf16>, vector<2x8xbf16>, vector<2x8xbf16>, vector<2x8xbf16>, vector<2x8xbf16>, vector<2x8xbf16>, vector<2x8xbf16>, vector<2x8xbf16> -> vector<2x128xbf16>
    %c0_14 = arith.constant 0 : index
    %c0_15 = arith.constant 0 : index
    %47 = vector.load %arg6[%c0_14, %c0_15] : memref<128x32xbf16, #tpu.memory_space<vmem>>, vector<128x32xbf16>
    %cst_16 = arith.constant dense<0.000000e+00> : vector<2x32xf32>
    %48 = tpu.matmul %46, %47, %cst_16 {dimension_numbers = #tpu.dot_dimension_numbers<[1], [0], [0], [1], [0, 0, 1, 1], [], []>} : vector<2x128xbf16>, vector<128x32xbf16>, vector<2x32xf32> -> vector<2x32xf32>
    %c0_17 = arith.constant 0 : index
    %c0_18 = arith.constant 0 : index
    %49 = vector.load %arg7[%c0_17, %c0_18] : memref<1x32xf32, #tpu.memory_space<vmem>>, vector<1x32xf32>
    %50 = vector.broadcast %49 : vector<1x32xf32> to vector<2x32xf32>
    %51 = arith.addf %48, %50 : vector<2x32xf32>
    %cst_19 = arith.constant 0.000000e+00 : f32
    %52 = vector.broadcast %cst_19 : f32 to vector<2x32xf32>
    %53 = arith.maximumf %51, %52 : vector<2x32xf32>
    %54 = arith.truncf %53 : vector<2x32xf32> to vector<2x32xbf16>
    %c0_20 = arith.constant 0 : index
    %c0_21 = arith.constant 0 : index
    %55 = vector.load %arg8[%c0_20, %c0_21] : memref<32x128xbf16, #tpu.memory_space<vmem>>, vector<32x128xbf16>
    %cst_22 = arith.constant dense<0.000000e+00> : vector<2x128xf32>
    %56 = tpu.matmul %54, %55, %cst_22 {dimension_numbers = #tpu.dot_dimension_numbers<[1], [0], [0], [1], [0, 0, 1, 1], [], []>} : vector<2x32xbf16>, vector<32x128xbf16>, vector<2x128xf32> -> vector<2x128xf32>
    %c0_23 = arith.constant 0 : index
    %c0_24 = arith.constant 0 : index
    %57 = vector.load %arg9[%c0_23, %c0_24] : memref<1x128xf32, #tpu.memory_space<vmem>>, vector<1x128xf32>
    %58 = vector.broadcast %57 : vector<1x128xf32> to vector<2x128xf32>
    %59 = arith.addf %56, %58 : vector<2x128xf32>
    %c0_25 = arith.constant 0 : index
    %c0_26 = arith.constant 0 : index
    %60 = vector.load %arg10[%c0_25, %c0_26] : memref<2x128xf32, #tpu.memory_space<vmem>>, vector<2x128xf32>
    tpu.vector_store %arg10[%c0_25, %c0_26], %59 {strides = array<i32>} : memref<2x128xf32, #tpu.memory_space<vmem>>, vector<2x128xf32>,
    return
  }
}

</mosaic_0001>

<bundles_post_ra>
// kernel: rnd_net_forward.1
= control target key start
LH: loop header
LB: loop body
LE: loop exit
PB: predicated region body
PF: predicated region fallthrough
CT: control target
= control target key end

     0   :  { %vm190_vm0 = vcmask 293888   ;;  %vm245_vm1 = vcmask 1041408   ;;  %v1475_v4 = vmov 0   ;;  %s2027_s0 = inlined_call_operand.vmem [shape: bf16[288,36], index: 0, kind: input, shape index: {}]   ;;  %s2028_s1 = inlined_call_operand.vmem [shape: f32[288,1], index: 1, kind: input, shape index: {}]   ;;  %s2029_s2 = inlined_call_operand.vmem [shape: bf16[36,8], index: 2, kind: input, shape index: {}]   ;;  %s2030_s3 = inlined_call_operand.vmem [shape: f32[1,8], index: 3, kind: input, shape index: {}]   ;;  %s2031_s4 = inlined_call_operand.vmem [shape: bf16[72,8], index: 4, kind: input, shape index: {}]   ;;  %s2032_s5 = inlined_call_operand.vmem [shape: f32[1,8], index: 5, kind: input, shape index: {}]   ;;  %s2033_s6 = inlined_call_operand.vmem [shape: bf16[128,32], index: 6, kind: input, shape index: {}]   ;;  %s2034_s7 = inlined_call_operand.vmem [shape: f32[1,32], index: 7, kind: input, shape index: {}]   ;;  %s2035_s8 = inlined_call_operand.vmem [shape: bf16[32,128], index: 8, kind: input, shape index: {}]   ;;  %s2036_s9 = inlined_call_operand.vmem [shape: f32[1,128], index: 9, kind: input, shape index: {}]   ;;  %s2037_s10 = inlined_call_operand.hbm [shape: f32[2,128], index: 10, kind: output, shape index: {}]  }
   0x1   :  { %v1415_v0 = vld [vmem:[%s2029_s2] sm:$0xff]   ;;  %v1416_v1 = vld [vmem:[%s2029_s2 + $0x8] sm:$0xff]   ;;  %v1417_v2 = vld [vmem:[%s2029_s2 + $0x10] ss:$0 sps:$4 sm:$0x33]   ;;  %1413 = vset.pattern.permute.xlu0 %v1475_v4  ;;  %1414 = vset.pattern.permute.xlu1 %v1475_v4 }
   0x2   :  { %1308 = vmatprep.subr.bf16.mxu0 %v1415_v0  ;;  %v1418_v3 = vld [vmem:[%s2027_s0] sm:$0xff]   ;;  %v247_v5 = vsel %vm245_vm1, %v1417_v2, 0  ;;  %v468_v7 = vld [vmem:[%s2028_s1 + $0x30] sm:$0xff]  ;;  %v1419_v8 = vld [vmem:[%s2027_s0 + $0x8] sm:$0xff]  }
   0x3   :  { %1309 = vmatpush3.bf16.msra.mxu0 %v1415_v0  ;;  %1314 = vmatprep.mubr.msk.bf16.mxu0 %vm190_vm0, %v1418_v3  ;;  %v466_v6 = vld [vmem:[%s2028_s1 + $0x20] sm:$0xff]  ;;  %v467_v9 = vld [vmem:[%s2028_s1 + $0x28] sm:$0xff]  ;;  %v1420_v10 = vld [vmem:[%s2027_s0 + $0x10] sm:$0xff]  }
   0x4   :  { %1310 = vmatprep.subr.bf16.mxu0 %v1416_v1  ;;  %520 = vperm.xlu0 %1413, %v466_v6   ;;  %v469_v11 = vld [vmem:[%s2028_s1 + $0x38] sm:$0xff]  ;;  %v470_v12 = vld [vmem:[%s2028_s1 + $0x40] sm:$0xff]  ;;  %v471_v13 = vld [vmem:[%s2028_s1 + $0x48] sm:$0xff] }
   0x5   :  { %530 = vperm.xlu1 %1414, %v468_v7   ;;  %v1421_v14 = vld [vmem:[%s2027_s0 + $0x18] sm:$0xff]   ;;  %v1422_v15 = vld [vmem:[%s2027_s0 + $0x20] sm:$0xff]   ;;  %v472_v16 = vld [vmem:[%s2028_s1 + $0x50] sm:$0xff] }
   0x6   :  { %v473_v17 = vld [vmem:[%s2028_s1 + $0x58] sm:$0xff]  ;;  %v474_v18 = vld [vmem:[%s2028_s1 + $0x60] sm:$0xff]  ;;  %v475_v19 = vld [vmem:[%s2028_s1 + $0x68] sm:$0xff] }
   0x7   :  { %1311 = vmatpush3.bf16.msra.mxu0 %v1416_v1  ;;  %v1423_v20 = vld [vmem:[%s2027_s0 + $0x28] sm:$0xff]   ;;  %v1424_v21 = vld [vmem:[%s2027_s0 + $0x30] sm:$0xff]   ;;  %v477_v23 = vld [vmem:[%s2028_s1 + $0x78] sm:$0xff] }
   0x8   :  { %1392 = vmatprep.subr.msk.bf16.mxu0 %vm245_vm1, %v1417_v2  ;;  %525 = vperm.xlu0 %1413, %v467_v9   ;;  %v476_v22 = vld [vmem:[%s2028_s1 + $0x70] sm:$0xff]  ;;  %v478_v24 = vld [vmem:[%s2028_s1 + $0x80] sm:$0xff]  ;;  %v479_v25 = vld [vmem:[%s2028_s1 + $0x88] sm:$0xff] }
   0x9   :  { %535 = vperm.xlu1 %1414, %v469_v11   ;;  %v1425_v26 = vld [vmem:[%s2027_s0 + $0x38] sm:$0xff]   ;;  %v480_v27 = vld [vmem:[%s2028_s1 + $0x90] sm:$0xff]  ;;  %v1426_v28 = vld [vmem:[%s2027_s0 + $0x40] sm:$0xff]  }
   0xa   :  { %v481_v29 = vld [vmem:[%s2028_s1 + $0x98] sm:$0xff]  ;;  %v482_v30 = vld [vmem:[%s2028_s1 + $0xa0] sm:$0xff]  ;;  %v483_v31 = vld [vmem:[%s2028_s1 + $0xa8] sm:$0xff] }
   0xb   :  { %1313 = vmatpush3.bf16.msra.mxu0 %v247_v5  ;;  %v1427_v32 = vld [vmem:[%s2027_s0 + $0x48] sm:$0xff]   ;;  %v484_v33 = vld [vmem:[%s2028_s1 + $0xb0] sm:$0xff] }
   0xc   :  { %540 = vperm.xlu0 %1413, %v470_v12  }
   0xd   :  { %545 = vperm.xlu1 %1414, %v471_v13  }
   0xe   :  { %1315 = vmatmul.mubr.msk.bf16.vlgmr.msra.gmra.mrb[0].mxu0 %vm190_vm0, %v1419_v8 }
   0xf   :  { %1318 = vmatprep.mubr.msk.bf16.mxu0 %vm190_vm0, %v1420_v10 }
  0x10   :  { %550 = vperm.xlu0 %1413, %v472_v16  }
  0x11   :  { %555 = vperm.xlu1 %1414, %v473_v17  }
  0x14   :  { %560 = vperm.xlu0 %1413, %v474_v18  }
  0x15   :  { %565 = vperm.xlu1 %1414, %v475_v19  }
  0x16   :  { %1319 = vmatmul.mubr.msk.bf16.gmra.mrb[4].mxu0 %vm190_vm0, %v1421_v14 }
  0x17   :  { %1322 = vmatprep.mubr.msk.bf16.mxu0 %vm190_vm0, %v1422_v15 }
  0x18   :  { %570 = vperm.xlu0 %1413, %v476_v22  }
  0x19   :  { %575 = vperm.xlu1 %1414, %v477_v23  }
  0x1c   :  { %580 = vperm.xlu0 %1413, %v478_v24  }
  0x1d   :  { %585 = vperm.xlu1 %1414, %v479_v25  }
  0x1e   :  { %1323 = vmatmul.mubr.msk.bf16.gmra.mrb[8].mxu0 %vm190_vm0, %v1423_v20 }
  0x1f   :  { %1326 = vmatprep.mubr.msk.bf16.mxu0 %vm190_vm0, %v1424_v21 }
  0x20   :  { %590 = vperm.xlu0 %1413, %v480_v27  }
  0x21   :  { %595 = vperm.xlu1 %1414, %v481_v29  }
  0x24   :  { %600 = vperm.xlu0 %1413, %v482_v30  }
  0x25   :  { %605 = vperm.xlu1 %1414, %v483_v31  }
  0x26   :  { %1327 = vmatmul.mubr.msk.bf16.gmra.mrb[12].mxu0 %vm190_vm0, %v1425_v26 }
  0x27   :  { %1330 = vmatprep.mubr.msk.bf16.mxu0 %vm190_vm0, %v1426_v28 }
  0x28   :  { %15 = vsyncpa [#allocation3], 0  ;;  %v1428_v34 = vld [vmem:[%s2027_s0 + $0x50] sm:$0xff]   ;;  %v485_v35 = vld [vmem:[%s2028_s1 + $0xb8] sm:$0xff]  ;;  %610 = vperm.xlu0 %1413, %v484_v33   ;;  %s1477_s22 = smov 16   ;;  %s1478_s2 = smov 24  }
  0x29   :  { %615 = vperm.xlu1 %1414, %v485_v35   ;;  %v486_v36 = vld [vmem:[%s2028_s1 + $0xc0] sm:$0xff]  ;;  %v487_v37 = vld [vmem:[%s2028_s1 + $0xc8] sm:$0xff]  ;;  %v1429_v38 = vld [vmem:[%s2027_s0 + $0x58] sm:$0xff]   ;;  %s1479_s25 = smov 32   ;;  %s1480_s30 = smov 40   ;;  %vm870_vm2 = vcmask 1043456  }
  0x2a   :  { %v488_v39 = vld [vmem:[%s2028_s1 + $0xd0] sm:$0xff]  ;;  %v1430_v40 = vld [vmem:[%s2027_s0 + $0x60] sm:$0xff]   ;;  %v489_v41 = vld [vmem:[%s2028_s1 + $0xd8] sm:$0xff]  ;;  %s1482_s15 = smov 56   ;;  %s1483_s16 = smov 64   ;;  %vm780_vm3 = vcmask 64512  }
  0x2b   :  { %v490_v42 = vld [vmem:[%s2028_s1 + $0xe0] sm:$0xff]  ;;  %v491_v43 = vld [vmem:[%s2028_s1 + $0xe8] sm:$0xff]  ;;  %v492_v45 = vld [vmem:[%s2028_s1 + $0xf0] sm:$0xff]  ;;  %vm787_vm4 = vcmask 130048   ;;  %vm792_vm5 = vcmask 195584   ;;  %vm797_vm6 = vcmask 261120  }
  0x2c   :  { %620 = vperm.xlu0 %1413, %v486_v36   ;;  %v1431_v44 = vld [vmem:[%s2027_s0 + $0x68] sm:$0xff]   ;;  %v1432_v46 = vld [vmem:[%s2027_s0 + $0x70] sm:$0xff]   ;;  %v493_v47 = vld [vmem:[%s2028_s1 + $0xf8] sm:$0xff]  ;;  %vm802_vm7 = vcmask 326656   ;;  %vm807_vm8 = vcmask 392192   ;;  %vm812_vm9 = vcmask 457728  }
  0x2d   :  { %625 = vperm.xlu1 %1414, %v487_v37   ;;  %v494_v48 = vld [vmem:[%s2028_s1 + $0x100] sm:$0xff]  ;;  %v495_v49 = vld [vmem:[%s2028_s1 + $0x108] sm:$0xff]  ;;  %v1433_v50 = vld [vmem:[%s2027_s0 + $0x78] sm:$0xff]   ;;  %vm817_vm10 = vcmask 523264   ;;  %vm865_vm11 = vcmask 588800   ;;  %s1485_s26 = smov 72  }
  0x2e   :  { %1331 = vmatmul.mubr.msk.bf16.gmra.mrb[16].mxu0 %vm190_vm0, %v1427_v32  ;;  %v496_v51 = vld [vmem:[%s2028_s1 + $0x110] sm:$0xff]  ;;  %v1434_v52 = vld [vmem:[%s2027_s0 + $0x80] sm:$0xff]   ;;  %v497_v53 = vld [vmem:[%s2028_s1 + $0x118] sm:$0xff]  ;;  %s1486_s29 = smov 80   ;;  %s1487_s11 = smov 88   ;;  %vm1488_vm12 = vmmov 0  }
  0x2f   :  { %1334 = vmatprep.mubr.msk.bf16.mxu0 %vm190_vm0, %v1428_v34  ;;  %v462_v54 = vld [vmem:[%s2028_s1] sm:$0xff]  ;;  %v463_v55 = vld [vmem:[%s2028_s1 + $0x8] sm:$0xff]  ;;  %v464_v57 = vld [vmem:[%s2028_s1 + $0x10] sm:$0xff]  ;;  %vm994_vm13 = vcmask 654336   ;;  %vm997_vm14 = vcmask 719872   ;;  %vm1000_vm15 = vcmask 785408  }
  0x30   :  { %630 = vperm.xlu0 %1413, %v488_v39   ;;  %v1435_v56 = vld [vmem:[%s2027_s0 + $0x88] sm:$0xff]   ;;  %v465_v58 = vld [vmem:[%s2028_s1 + $0x18] sm:$0xff]  ;;  %v1805_v28 = vld [vmem:[%s2030_s3] ss:$0 sm:$0xff]  ;;  %s1476_s3 = smov 8   ;;  %vm1006_vm1 = vcmask 916480  }
  0x31   :  { %635 = vperm.xlu1 %1414, %v489_v41   ;;  %s1493_s1 = smov [#allocation2]  }
  0x34   :  { %640 = vperm.xlu0 %1413, %v490_v42  }
  0x35   :  { %645 = vperm.xlu1 %1414, %v491_v43  }
  0x36   :  { %1335 = vmatmul.mubr.msk.bf16.gmra.mrb[20].mxu0 %vm190_vm0, %v1429_v38 }
  0x37   :  { %1338 = vmatprep.mubr.msk.bf16.mxu0 %vm190_vm0, %v1430_v40 }
  0x38   :  { %650 = vperm.xlu0 %1413, %v492_v45  }
  0x39   :  { %655 = vperm.xlu1 %1414, %v493_v47  }
  0x3c   :  { %660 = vperm.xlu0 %1413, %v494_v48  }
  0x3d   :  { %665 = vperm.xlu1 %1414, %v495_v49  }
  0x3e   :  { %1339 = vmatmul.mubr.msk.bf16.gmra.mrb[24].mxu0 %vm190_vm0, %v1431_v44 }
  0x3f   :  { %1342 = vmatprep.mubr.msk.bf16.mxu0 %vm190_vm0, %v1432_v46 }
  0x40   :  { %670 = vperm.xlu0 %1413, %v496_v51  }
  0x41   :  { %675 = vperm.xlu1 %1414, %v497_v53  }
  0x44   :  { %500 = vperm.xlu0 %1413, %v462_v54  }
  0x45   :  { %505 = vperm.xlu1 %1414, %v463_v55  }
  0x46   :  { %1343 = vmatmul.mubr.msk.bf16.gmra.mrb[28].mxu0 %vm190_vm0, %v1433_v50 }
  0x47   :  { %1346 = vmatprep.mubr.msk.bf16.mxu0 %vm190_vm0, %v1434_v52 }
  0x48   :  { %510 = vperm.xlu0 %1413, %v464_v57  }
  0x49   :  { %515 = vperm.xlu1 %1414, %v465_v58  }
  0x4e   :  { %1347 = vmatmul.mubr.msk.bf16.gmra.mrb[32].mxu0 %vm190_vm0, %v1435_v56  ;;  %vm1003_vm0 = vcmask 850944  }
  0x83   :  { %v1738_v59 = vpop.permute.xlu0 %520 }
  0x84   :  { %v1740_v60 = vpop.permute.xlu1 %530 }
  0x87   :  { %v1742_v61 = vpop.permute.xlu0 %525 }
  0x88   :  { %v1744_v62 = vpop.permute.xlu1 %535 }
  0x8b   :  { %v1746_v63 = vpop.permute.xlu0 %540 }
  0x8c   :  { %v1748_v0 = vpop.permute.xlu1 %545 }
  0x8f   :  { %v1750_v1 = vpop.permute.xlu0 %550 }
  0x90   :  { %v1752_v2 = vpop.permute.xlu1 %555 }
  0x93   :  { %v1754_v3 = vpop.permute.xlu0 %560 }
  0x94   :  { %v1756_v4 = vpop.permute.xlu1 %565 }
  0x97   :  { %v1758_v5 = vpop.permute.xlu0 %570 }
  0x98   :  { %v1760_v6 = vpop.permute.xlu1 %575 }
  0x9b   :  { %v1762_v7 = vpop.permute.xlu0 %580 }
  0x9c   :  { %v1764_v8 = vpop.permute.xlu1 %585 }
  0x9f   :  { %v1766_v9 = vpop.permute.xlu0 %590 }
  0xa0   :  { %v1768_v10 = vpop.permute.xlu1 %595 }
  0xa3   :  { %v1770_v11 = vpop.permute.xlu0 %600 }
  0xa4   :  { %v1772_v12 = vpop.permute.xlu1 %605 }
  0xa7   :  { %v1774_v13 = vpop.permute.xlu0 %610 }
  0xa8   :  { %v1776_v14 = vpop.permute.xlu1 %615 }
  0xab   :  { %v1778_v15 = vpop.permute.xlu0 %620 }
  0xac   :  { %v1780_v16 = vpop.permute.xlu1 %625 }
  0xaf   :  { %v1782_v17 = vpop.permute.xlu0 %630 }
  0xb0   :  { %v1784_v18 = vpop.permute.xlu1 %635 }
  0xb3   :  { %v1786_v19 = vpop.permute.xlu0 %640 }
  0xb4   :  { %v1788_v20 = vpop.permute.xlu1 %645 }
  0xb7   :  { %v1790_v21 = vpop.permute.xlu0 %650 }
  0xb8   :  { %v1792_v22 = vpop.permute.xlu1 %655 }
  0xbb   :  { %v1794_v23 = vpop.permute.xlu0 %660 }
  0xbc   :  { %v1796_v24 = vpop.permute.xlu1 %665 }
  0xbf   :  { %v1798_v25 = vpop.permute.xlu0 %670 }
  0xc0   :  { %v1800_v26 = vpop.permute.xlu1 %675 }
  0xc3   :  { %v501_v27 = vpop.permute.xlu0 %500 }
  0xc4   :  { %v506_v29 = vpop.permute.xlu1 %505 }
  0xc7   :  { %v511_v40 = vpop.permute.xlu0 %510 }
  0xc8   :  { %v516_v41 = vpop.permute.xlu1 %515 }
  0xe1   :  { %v1316_v30 = vpop.f32.mrb[0].mxu0 }
  0xe2   :  { %v292_v31 = vadd.f32 %v1316_v30, %v1805_v28  ;;  %v283_v32 = vpop.f32.mrb[1].mxu0 }
  0xe3   :  { %v284_v33 = vadd.f32 %v1805_v28, %v283_v32  ;;  %v1317_v34 = vpop.f32.mrb[2].mxu0 }
  0xe4   :  { %v428_v35 = vmax.f32 %v292_v31, 0.0  ;;  %v295_v36 = vadd.f32 %v1317_v34, %v1805_v28  ;;  %v286_v37 = vpop.f32.mrb[3].mxu0 }
  0xe5   :  { %v426_v38 = vmax.f32 %v284_v33, 0.0  ;;  %v287_v39 = vadd.f32 %v1805_v28, %v286_v37 }
  0xe6   :  { %v429_v42 = vmax.f32 %v295_v36, 0.0  ;;  %v1811_v44 = vmul.f32 %v511_v40, %v428_v35 }
  0xe7   :  { %v427_v43 = vmax.f32 %v287_v39, 0.0  ;;  %v1815_v46 = vmul.f32 %v501_v27, %v426_v38 }
  0xe8   :  { %v1813_v45 = vmul.f32 %v516_v41, %v429_v42 }
  0xe9   :  { %v1817_v47 = vmul.f32 %v506_v29, %v427_v43  ;;  %v1320_v48 = vpop.f32.mrb[4].mxu0 }
  0xea   :  { %v715_v49 = vpack.c.bf16 %v1813_v45, %v1811_v44  ;;  %v308_v50 = vadd.f32 %v1320_v48, %v1805_v28  ;;  %v299_v51 = vpop.f32.mrb[5].mxu0 }
  0xeb   :  { %v714_v52 = vpack.c.bf16 %v1817_v47, %v1815_v46  ;;  %v300_v53 = vadd.f32 %v1805_v28, %v299_v51  ;;  %v1321_v54 = vpop.f32.mrb[6].mxu0 }
  0xec   :  { %v432_v55 = vmax.f32 %v308_v50, 0.0  ;;  %v311_v56 = vadd.f32 %v1321_v54, %v1805_v28  ;;  %v302_v57 = vpop.f32.mrb[7].mxu0 }
  0xed   :  { %v430_v58 = vmax.f32 %v300_v53, 0.0  ;;  %v303_v27 = vadd.f32 %v1805_v28, %v302_v57 }
  0xee   :  { %v433_v29 = vmax.f32 %v311_v56, 0.0  ;;  %v684_v31 = vmul.f32 %v1740_v60, %v432_v55 }
  0xef   :  { %v431_v30 = vmax.f32 %v303_v27, 0.0  ;;  %v682_v33 = vmul.f32 %v1738_v59, %v430_v58 }
  0xf0   :  { %v685_v32 = vmul.f32 %v1744_v62, %v433_v29 }
  0xf1   :  { %v683_v34 = vmul.f32 %v1742_v61, %v431_v30  ;;  %v1324_v35 = vpop.f32.mrb[8].mxu0 }
  0xf2   :  { %v324_v36 = vadd.f32 %v1324_v35, %v1805_v28  ;;  %v315_v37 = vpop.f32.mrb[9].mxu0  ;;  %v717_v38 = vpack.c.bf16 %v685_v32, %v684_v31 }
  0xf3   :  { %v316_v39 = vadd.f32 %v1805_v28, %v315_v37  ;;  %v1325_v40 = vpop.f32.mrb[10].mxu0  ;;  %v716_v41 = vpack.c.bf16 %v683_v34, %v682_v33 }
  0xf4   :  { %v436_v42 = vmax.f32 %v324_v36, 0.0  ;;  %v327_v43 = vadd.f32 %v1325_v40, %v1805_v28  ;;  %736 = vrot.lane.b32.xlu1 %v717_v38, %s1476_s3  ;;  %v318_v60 = vpop.f32.mrb[11].mxu0 }
  0xf5   :  { %v434_v62 = vmax.f32 %v316_v39, 0.0  ;;  %v319_v59 = vadd.f32 %v1805_v28, %v318_v60  ;;  %734 = vrot.lane.b32.xlu0 %v716_v41, %s1476_s3 }
  0xf6   :  { %v437_v61 = vmax.f32 %v327_v43, 0.0  ;;  %v688_v50 = vmul.f32 %v1750_v1, %v436_v42 }
  0xf7   :  { %v435_v48 = vmax.f32 %v319_v59, 0.0  ;;  %v686_v53 = vmul.f32 %v1746_v63, %v434_v62 }
  0xf8   :  { %v689_v51 = vmul.f32 %v1752_v2, %v437_v61 }
  0xf9   :  { %v687_v54 = vmul.f32 %v1748_v0, %v435_v48  ;;  %v1328_v55 = vpop.f32.mrb[12].mxu0 }
  0xfa   :  { %v340_v56 = vadd.f32 %v1328_v55, %v1805_v28  ;;  %v331_v57 = vpop.f32.mrb[13].mxu0  ;;  %v719_v58 = vpack.c.bf16 %v689_v51, %v688_v50  ;;  %v1436_v51 = vld [vmem:[%s2031_s4] sm:$0xff]  }
  0xfb   :  { %v332_v27 = vadd.f32 %v1805_v28, %v331_v57  ;;  %v1329_v29 = vpop.f32.mrb[14].mxu0  ;;  %v718_v30 = vpack.c.bf16 %v687_v54, %v686_v53  ;;  %1350 = vmatprep.subr.bf16.mxu1 %v1436_v51 }
  0xfc   :  { %v440_v31 = vmax.f32 %v340_v56, 0.0  ;;  %v343_v32 = vadd.f32 %v1329_v29, %v1805_v28  ;;  %742 = vrot.lane.b32.xlu1 %v719_v58, %s1477_s22  ;;  %v334_v1 = vpop.f32.mrb[15].mxu0  ;;  %1351 = vmatpush3.bf16.msra.mxu1 %v1436_v51 }
  0xfd   :  { %v438_v2 = vmax.f32 %v332_v27, 0.0  ;;  %v335_v63 = vadd.f32 %v1805_v28, %v334_v1  ;;  %740 = vrot.lane.b32.xlu0 %v718_v30, %s1477_s22 }
  0xfe   :  { %v441_v0 = vmax.f32 %v343_v32, 0.0  ;;  %v692_v34 = vmul.f32 %v1758_v5, %v440_v31 }
  0xff   :  { %v439_v33 = vmax.f32 %v335_v63, 0.0  ;;  %v690_v36 = vmul.f32 %v1754_v3, %v438_v2 }
 0x100   :  { %v693_v35 = vmul.f32 %v1760_v6, %v441_v0  ;;  %v1437_v0 = vld [vmem:[%s2031_s4 + $0x8] sm:$0xff]  }
 0x101   :  { %v691_v37 = vmul.f32 %v1756_v4, %v439_v33  ;;  %v1332_v38 = vpop.f32.mrb[16].mxu0  ;;  %v1438_v33 = vld [vmem:[%s2031_s4 + $0x10] sm:$0xff]   ;;  %1352 = vmatprep.subr.bf16.mxu1 %v1437_v0 }
 0x102   :  { %v356_v39 = vadd.f32 %v1332_v38, %v1805_v28  ;;  %v347_v40 = vpop.f32.mrb[17].mxu0  ;;  %v721_v41 = vpack.c.bf16 %v693_v35, %v692_v34  ;;  %1353 = vmatpush3.bf16.msra.mxu1 %v1437_v0 }
 0x103   :  { %v348_v42 = vadd.f32 %v1805_v28, %v347_v40  ;;  %v1333_v43 = vpop.f32.mrb[18].mxu0  ;;  %v720_v60 = vpack.c.bf16 %v691_v37, %v690_v36  ;;  %1354 = vmatprep.subr.bf16.mxu1 %v1438_v33 }
 0x104   :  { %v444_v62 = vmax.f32 %v356_v39, 0.0  ;;  %v359_v59 = vadd.f32 %v1333_v43, %v1805_v28  ;;  %748 = vrot.lane.b32.xlu1 %v721_v41, %s1478_s2  ;;  %v350_v5 = vpop.f32.mrb[19].mxu0 }
 0x105   :  { %v442_v6 = vmax.f32 %v348_v42, 0.0  ;;  %v351_v3 = vadd.f32 %v1805_v28, %v350_v5  ;;  %746 = vrot.lane.b32.xlu0 %v720_v60, %s1478_s2 }
 0x106   :  { %v445_v4 = vmax.f32 %v359_v59, 0.0  ;;  %v696_v48 = vmul.f32 %v1766_v9, %v444_v62  ;;  %1355 = vmatpush3.bf16.msra.mxu1 %v1438_v33 }
 0x107   :  { %v443_v61 = vmax.f32 %v351_v3, 0.0  ;;  %v694_v53 = vmul.f32 %v1762_v7, %v442_v6  ;;  %v1439_v6 = vld [vmem:[%s2031_s4 + $0x18] sm:$0xff]   ;;  %v1440_v3 = vld [vmem:[%s2031_s4 + $0x20] ss:$0 sps:$4 sm:$0xff]   ;;  %s1481_s4 = smov 48  }
 0x108   :  { %v697_v50 = vmul.f32 %v1768_v10, %v445_v4  ;;  %1356 = vmatprep.subr.bf16.mxu1 %v1439_v6 }
 0x109   :  { %v695_v54 = vmul.f32 %v1764_v8, %v443_v61  ;;  %v1336_v55 = vpop.f32.mrb[20].mxu0 }
 0x10a   :  { %v372_v56 = vadd.f32 %v1336_v55, %v1805_v28  ;;  %v363_v57 = vpop.f32.mrb[21].mxu0  ;;  %v723_v58 = vpack.c.bf16 %v697_v50, %v696_v48  ;;  %1357 = vmatpush3.bf16.msra.mxu1 %v1439_v6 }
 0x10b   :  { %v364_v27 = vadd.f32 %v1805_v28, %v363_v57  ;;  %v1337_v29 = vpop.f32.mrb[22].mxu0  ;;  %v722_v9 = vpack.c.bf16 %v695_v54, %v694_v53  ;;  %1393 = vmatprep.subr.msk.bf16.mxu1 %vm870_vm2, %v1440_v3 }
 0x10c   :  { %v448_v10 = vmax.f32 %v372_v56, 0.0  ;;  %v375_v30 = vadd.f32 %v1337_v29, %v1805_v28  ;;  %754 = vrot.lane.b32.xlu1 %v723_v58, %s1479_s25  ;;  %v366_v7 = vpop.f32.mrb[23].mxu0 }
 0x10d   :  { %v446_v31 = vmax.f32 %v364_v27, 0.0  ;;  %v367_v8 = vadd.f32 %v1805_v28, %v366_v7  ;;  %752 = vrot.lane.b32.xlu0 %v722_v9, %s1479_s25  ;;  %v872_v27 = vsel %vm870_vm2, %v1440_v3, 0  ;;  %vm1009_vm2 = vcmask 982016  }
 0x10e   :  { %v449_v32 = vmax.f32 %v375_v30, 0.0  ;;  %v700_v2 = vmul.f32 %v1774_v13, %v448_v10  ;;  %1359 = vmatpush3.bf16.msra.mxu1 %v872_v27 }
 0x10f   :  { %v447_v1 = vmax.f32 %v367_v8, 0.0  ;;  %v698_v34 = vmul.f32 %v1770_v11, %v446_v31 }
 0x110   :  { %v701_v63 = vmul.f32 %v1776_v14, %v449_v32 }
 0x111   :  { %v699_v35 = vmul.f32 %v1772_v12, %v447_v1  ;;  %v1340_v36 = vpop.f32.mrb[24].mxu0 }
 0x112   :  { %v388_v37 = vadd.f32 %v1340_v36, %v1805_v28  ;;  %v379_v38 = vpop.f32.mrb[25].mxu0  ;;  %v725_v39 = vpack.c.bf16 %v701_v63, %v700_v2 }
 0x113   :  { %v380_v13 = vadd.f32 %v1805_v28, %v379_v38  ;;  %v1341_v14 = vpop.f32.mrb[26].mxu0  ;;  %v724_v40 = vpack.c.bf16 %v699_v35, %v698_v34 }
 0x114   :  { %v452_v41 = vmax.f32 %v388_v37, 0.0  ;;  %v391_v42 = vadd.f32 %v1341_v14, %v1805_v28  ;;  %760 = vrot.lane.b32.xlu1 %v725_v39, %s1480_s30  ;;  %v382_v11 = vpop.f32.mrb[27].mxu0 }
 0x115   :  { %v450_v12 = vmax.f32 %v380_v13, 0.0  ;;  %v383_v43 = vadd.f32 %v1805_v28, %v382_v11  ;;  %758 = vrot.lane.b32.xlu0 %v724_v40, %s1480_s30 }
 0x116   :  { %v453_v60 = vmax.f32 %v391_v42, 0.0  ;;  %v704_v59 = vmul.f32 %v1782_v17, %v452_v41 }
 0x117   :  { %v451_v62 = vmax.f32 %v383_v43, 0.0  ;;  %v702_v4 = vmul.f32 %v1778_v15, %v450_v12 }
 0x118   :  { %v705_v5 = vmul.f32 %v1784_v18, %v453_v60 }
 0x119   :  { %v703_v61 = vmul.f32 %v1780_v16, %v451_v62  ;;  %v1344_v48 = vpop.f32.mrb[28].mxu0 }
 0x11a   :  { %v404_v50 = vadd.f32 %v1344_v48, %v1805_v28  ;;  %v395_v51 = vpop.f32.mrb[29].mxu0  ;;  %v727_v17 = vpack.c.bf16 %v705_v5, %v704_v59 }
 0x11b   :  { %v396_v18 = vadd.f32 %v1805_v28, %v395_v51  ;;  %v1345_v53 = vpop.f32.mrb[30].mxu0  ;;  %v726_v54 = vpack.c.bf16 %v703_v61, %v702_v4 }
 0x11c   :  { %v456_v55 = vmax.f32 %v404_v50, 0.0  ;;  %v407_v56 = vadd.f32 %v1345_v53, %v1805_v28  ;;  %766 = vrot.lane.b32.xlu1 %v727_v17, %s1481_s4  ;;  %v398_v15 = vpop.f32.mrb[31].mxu0 }
 0x11d   :  { %v454_v16 = vmax.f32 %v396_v18, 0.0  ;;  %v399_v57 = vadd.f32 %v1805_v28, %v398_v15  ;;  %764 = vrot.lane.b32.xlu0 %v726_v54, %s1481_s4  ;;  %v1247_v15 = vld [vmem:[%s2032_s5] ss:$0 sm:$0xff] }
 0x11e   :  { %v457_v58 = vmax.f32 %v407_v56, 0.0  ;;  %v708_v9 = vmul.f32 %v1790_v21, %v456_v55  ;;  %v1484_v55 = vmov 0.0   ;;  %v1441_v56 = vld [vmem:[%s2033_s6] sm:$0xff]  }
 0x11f   :  { %v455_v29 = vmax.f32 %v399_v57, 0.0  ;;  %v706_v30 = vmul.f32 %v1786_v19, %v454_v16  ;;  %1364 = vmatprep.subr.bf16.mxu1 %v1484_v55  ;;  %v1442_v16 = vld [vmem:[%s2033_s6 + $0x8] sm:$0xff]  }
 0x120   :  { %v709_v10 = vmul.f32 %v1792_v22, %v457_v58 }
 0x121   :  { %v707_v7 = vmul.f32 %v1788_v20, %v455_v29  ;;  %v1348_v31 = vpop.f32.mrb[32].mxu0 }
 0x122   :  { %v420_v8 = vadd.f32 %v1348_v31, %v1805_v28  ;;  %v411_v32 = vpop.f32.mrb[33].mxu0  ;;  %v729_v1 = vpack.c.bf16 %v709_v10, %v708_v9 }
 0x123   :  { %v412_v2 = vadd.f32 %v1805_v28, %v411_v32  ;;  %v1349_v63 = vpop.f32.mrb[34].mxu0  ;;  %v728_v0 = vpack.c.bf16 %v707_v7, %v706_v30  ;;  %v1443_v7 = vld [vmem:[%s2033_s6 + $0x10] sm:$0xff]  }
 0x124   :  { %v460_v33 = vmax.f32 %v420_v8, 0.0  ;;  %v423_v34 = vadd.f32 %v1349_v63, %v1805_v28  ;;  %772 = vrot.lane.b32.xlu1 %v729_v1, %s1482_s15  ;;  %v414_v21 = vpop.f32.mrb[35].mxu0 }
 0x125   :  { %v458_v22 = vmax.f32 %v412_v2, 0.0  ;;  %v415_v19 = vadd.f32 %v1805_v28, %v414_v21  ;;  %770 = vrot.lane.b32.xlu0 %v728_v0, %s1482_s15  ;;  %v1444_v0 = vld [vmem:[%s2033_s6 + $0x18] sm:$0xff]  }
 0x126   :  { %v461_v20 = vmax.f32 %v423_v34, 0.0  ;;  %v712_v36 = vmul.f32 %v1798_v25, %v460_v33 }
 0x127   :  { %v459_v35 = vmax.f32 %v415_v19, 0.0  ;;  %v710_v38 = vmul.f32 %v1794_v23, %v458_v22  ;;  %v1445_v22 = vld [vmem:[%s2033_s6 + $0x20] sm:$0xff]  }
 0x128   :  { %v713_v37 = vmul.f32 %v1800_v26, %v461_v20 }
 0x129   :  { %v711_v39 = vmul.f32 %v1796_v24, %v459_v35  ;;  %v1446_v35 = vld [vmem:[%s2033_s6 + $0x28] sm:$0xff]  }
 0x12a   :  { %v731_v13 = vpack.c.bf16 %v713_v37, %v712_v36 }
 0x12b   :  { %v730_v14 = vpack.c.bf16 %v711_v39, %v710_v38  ;;  %v1447_v38 = vld [vmem:[%s2033_s6 + $0x30] sm:$0xff]  }
 0x12c   :  { %778 = vrot.lane.b32.xlu1 %v731_v13, %s1483_s16 }
 0x12d   :  { %776 = vrot.lane.b32.xlu0 %v730_v14, %s1483_s16  ;;  %v1448_v14 = vld [vmem:[%s2033_s6 + $0x38] sm:$0xff]   ;;  %s1490_s6 = smov 112  }
 0x166   :  { %v737_v28 = vpop.permute.xlu1 %736 }
 0x167   :  { %v735_v40 = vpop.permute.xlu0 %734  ;;  %v786_v59 = vsel %vm780_vm3, %v715_v49, %v737_v28 }
 0x168   :  { %v783_v62 = vsel %vm780_vm3, %v714_v52, %v735_v40 }
 0x16e   :  { %v743_v41 = vpop.permute.xlu1 %742 }
 0x16f   :  { %v741_v42 = vpop.permute.xlu0 %740  ;;  %v791_v3 = vsel %vm787_vm4, %v786_v59, %v743_v41 }
 0x170   :  { %v789_v5 = vsel %vm787_vm4, %v783_v62, %v741_v42 }
 0x176   :  { %v749_v11 = vpop.permute.xlu1 %748 }
 0x177   :  { %v747_v12 = vpop.permute.xlu0 %746  ;;  %v796_v46 = vsel %vm792_vm5, %v791_v3, %v749_v11 }
 0x178   :  { %v794_v4 = vsel %vm792_vm5, %v789_v5, %v747_v12 }
 0x17e   :  { %v755_v25 = vpop.permute.xlu1 %754 }
 0x17f   :  { %v753_v43 = vpop.permute.xlu0 %752  ;;  %v801_v52 = vsel %vm797_vm6, %v796_v46, %v755_v25 }
 0x180   :  { %v799_v47 = vsel %vm797_vm6, %v794_v4, %v753_v43 }
 0x186   :  { %v761_v26 = vpop.permute.xlu1 %760 }
 0x187   :  { %v759_v60 = vpop.permute.xlu0 %758  ;;  %v806_v45 = vsel %vm802_vm7, %v801_v52, %v761_v26 }
 0x188   :  { %v804_v44 = vsel %vm802_vm7, %v799_v47, %v759_v60 }
 0x18e   :  { %v767_v23 = vpop.permute.xlu1 %766 }
 0x18f   :  { %v765_v24 = vpop.permute.xlu0 %764  ;;  %v811_v50 = vsel %vm807_vm8, %v806_v45, %v767_v23 }
 0x190   :  { %v809_v49 = vsel %vm807_vm8, %v804_v44, %v765_v24 }
 0x196   :  { %v773_v6 = vpop.permute.xlu1 %772 }
 0x197   :  { %v771_v61 = vpop.permute.xlu0 %770  ;;  %v816_v18 = vsel %vm812_vm9, %v811_v50, %v773_v6 }
 0x198   :  { %v814_v51 = vsel %vm812_vm9, %v809_v49, %v771_v61 }
 0x19e   :  { %v779_v48 = vpop.permute.xlu1 %778 }
 0x19f   :  { %v777_v17 = vpop.permute.xlu0 %776  ;;  %v821_v54 = vsel %vm817_vm10, %v816_v18, %v779_v48 }
 0x1a0   :  { %v819_v53 = vsel %vm817_vm10, %v814_v51, %v777_v17 }
 0x1a1   :  { %1360 = vmatprep.mubr.msk.bf16.mxu1 %vm865_vm11, %v819_v53 }
 0x1a2   :  { %1361 = vmatmul.mubr.msk.bf16.vlgmr.msra.gmra.mrb[0].mxu1 %vm865_vm11, %v821_v54 }
 0x1a3   :  { %1365 = vmatpush3.bf16.msra.mxu1 %v1441_v56  ;;  %1380 = vmatprep.mubr.msk.bf16.mxu1 %vm1488_vm12, %v1484_v55 }
 0x1a4   :  { %1366 = vmatprep.subr.bf16.mxu1 %v1484_v55 }
 0x1a7   :  { %1367 = vmatpush3.bf16.msra.mxu1 %v1442_v16 }
 0x1a8   :  { %1368 = vmatprep.subr.bf16.mxu1 %v1484_v55 }
 0x1ab   :  { %1369 = vmatpush3.bf16.msra.mxu1 %v1443_v7 }
 0x1ac   :  { %1370 = vmatprep.subr.bf16.mxu1 %v1484_v55 }
 0x1af   :  { %1371 = vmatpush3.bf16.msra.mxu1 %v1444_v0 }
 0x1b0   :  { %1372 = vmatprep.subr.bf16.mxu1 %v1484_v55 }
 0x1b3   :  { %1373 = vmatpush3.bf16.msra.mxu1 %v1445_v22 }
 0x1b4   :  { %1374 = vmatprep.subr.bf16.mxu1 %v1484_v55 }
 0x1b7   :  { %1375 = vmatpush3.bf16.msra.mxu1 %v1446_v35 }
 0x1b8   :  { %1376 = vmatprep.subr.bf16.mxu1 %v1484_v55 }
 0x1bb   :  { %1377 = vmatpush3.bf16.msra.mxu1 %v1447_v38 }
 0x1bc   :  { %1378 = vmatprep.subr.bf16.mxu1 %v1484_v55 }
 0x1bf   :  { %1379 = vmatpush3.bf16.msra.mxu1 %v1448_v14 }
 0x1c0   :  { %1384 = vmatprep.subr.bf16.mxu1 %v1484_v55 }
 0x275   :  { %v1362_v57 = vpop.f32.mrb[0].mxu1 }
 0x276   :  { %v917_v58 = vadd.f32 %v1362_v57, %v1247_v15  ;;  %v908_v27 = vpop.f32.mrb[1].mxu1 }
 0x277   :  { %v909_v29 = vadd.f32 %v1247_v15, %v908_v27  ;;  %v1363_v9 = vpop.f32.mrb[2].mxu1  ;;  %v1450_v27 = vld [vmem:[%s2035_s8 + $0x8] sm:$0xff]  }
 0x278   :  { %v920_v10 = vadd.f32 %v1363_v9, %v1247_v15  ;;  %v911_v30 = vpop.f32.mrb[3].mxu1  ;;  %v925_v8 = vmax.f32 %v917_v58, 0.0 }
 0x279   :  { %v912_v31 = vadd.f32 %v1247_v15, %v911_v30  ;;  %v923_v1 = vmax.f32 %v909_v29, 0.0  ;;  %v1449_v15 = vld [vmem:[%s2035_s8] sm:$0xff]   ;;  %s1199_s8 = sshll.u32 %s1493_s1, 4  ;;  %s1200_s8 = int_to_ptr.vmem [resolvable:$true] %s1199_s8 }
 0x27a   :  { %v926_v32 = vmax.f32 %v920_v10, 0.0  ;;  %v1255_v29 = vld [vmem:[%s2034_s7] ss:$0 sm:$0xff]  ;;  %s1451_s7 = scalar_lea.vmem %s1200_s8, 32  ;;  %p1456_p1 = scmp.lt.s32.totalorder %s1200_s8, %s1200_s8 }
 0x27b   :  { %v924_v2 = vmax.f32 %v912_v31, 0.0  ;;  %p1452_p0 = scmp.ne.s32.totalorder %s1200_s8, %s1451_s7  ;;  %p1457_p2 = scmp.lt.s32.totalorder %s1451_s7, %s1451_s7 }
 0x27c   :  { %v928_v63 = vpack.c.bf16 %v926_v32, %v925_v8 }
 0x27d   :  { %v927_v33 = vpack.c.bf16 %v924_v2, %v923_v1  ;;  %p1458_p3 = por %p1457_p2, %p1456_p1 }
 0x27e   :  { %952 = vrot.lane.b32.xlu1 %v928_v63, %s1483_s16  ;;  %v954_v34 = vrot.slane %v928_v63, 1  ;;  %v957_v21 = vrot.slane %v928_v63, 2  ;;  %v960_v19 = vrot.slane %v928_v63, 3  ;;  %v963_v40 = vrot.slane %v928_v63, 4 }
 0x27f   :  { %v933_v20 = vrot.slane %v927_v33, 2  ;;  %v930_v36 = vrot.slane %v927_v33, 1  ;;  %v939_v37 = vrot.slane %v927_v33, 4  ;;  %v936_v39 = vrot.slane %v927_v33, 3  ;;  %p1459_p4 = pnand %p1458_p3, %p1452_p0 }
 0x280   :  { %955 = vrot.lane.b32.xlu0 %v954_v34, %s1485_s26  ;;  %v945_v13 = vrot.slane %v927_v33, 6  ;;  %v942_v28 = vrot.slane %v927_v33, 5  ;;  %v948_v41 = vrot.slane %v927_v33, 7  ;;  %v969_v42 = vrot.slane %v928_v63, 6 }
 0x281   :  { %v966_v11 = vrot.slane %v928_v63, 5  ;;  %v972_v12 = vrot.slane %v928_v63, 7 }
 0x282   :  { %958 = vrot.lane.b32.xlu1 %v957_v21, %s1486_s29 }
 0x284   :  { %961 = vrot.lane.b32.xlu0 %v960_v19, %s1487_s11 }
 0x286   :  { %934 = vrot.lane.b32.xlu1 %v933_v20, %s1477_s22 }
 0x288   :  { %931 = vrot.lane.b32.xlu0 %v930_v36, %s1476_s3  ;;  %s1489_s3 = smov 96  }
 0x28a   :  { %940 = vrot.lane.b32.xlu1 %v939_v37, %s1479_s25  ;;  %s1492_s25 = smov 120  }
 0x28c   :  { %937 = vrot.lane.b32.xlu0 %v936_v39, %s1478_s2  ;;  %s1491_s2 = smov 104  }
 0x28e   :  { %946 = vrot.lane.b32.xlu1 %v945_v13, %s1481_s4 }
 0x290   :  { %943 = vrot.lane.b32.xlu0 %v942_v28, %s1480_s30 }
 0x292   :  { %964 = vrot.lane.b32.xlu1 %v963_v40, %s1489_s3 }
 0x294   :  { %949 = vrot.lane.b32.xlu0 %v948_v41, %s1482_s15 }
 0x296   :  { %970 = vrot.lane.b32.xlu1 %v969_v42, %s1490_s6 }
 0x298   :  { %967 = vrot.lane.b32.xlu0 %v966_v11, %s1491_s2 }
 0x29c   :  { %973 = vrot.lane.b32.xlu0 %v972_v12, %s1492_s25 }
 0x2f0   :  { %v953_v25 = vpop.permute.xlu1 %952 }
 0x2f2   :  { %v956_v43 = vpop.permute.xlu0 %955 }
 0x2f4   :  { %v959_v26 = vpop.permute.xlu1 %958 }
 0x2f6   :  { %v962_v60 = vpop.permute.xlu0 %961 }
 0x2f8   :  { %v935_v23 = vpop.permute.xlu1 %934 }
 0x2fa   :  { %v932_v24 = vpop.permute.xlu0 %931 }
 0x2fb   :  { %v977_v62 = vsel %vm780_vm3, %v927_v33, %v932_v24 }
 0x2fc   :  { %v941_v59 = vpop.permute.xlu1 %940  ;;  %v979_v5 = vsel %vm787_vm4, %v977_v62, %v935_v23 }
 0x2fe   :  { %v938_v6 = vpop.permute.xlu0 %937 }
 0x2ff   :  { %v981_v3 = vsel %vm792_vm5, %v979_v5, %v938_v6 }
 0x300   :  { %v947_v4 = vpop.permute.xlu1 %946  ;;  %v983_v61 = vsel %vm797_vm6, %v981_v3, %v941_v59 }
 0x302   :  { %v944_v46 = vpop.permute.xlu0 %943 }
 0x303   :  { %v985_v47 = vsel %vm802_vm7, %v983_v61, %v944_v46 }
 0x304   :  { %v987_v52 = vsel %vm807_vm8, %v985_v47, %v947_v4  ;;  %v965_v45 = vpop.permute.xlu1 %964 }
 0x306   :  { %v950_v44 = vpop.permute.xlu0 %949 }
 0x307   :  { %v989_v49 = vsel %vm812_vm9, %v987_v52, %v950_v44 }
 0x308   :  { %v991_v48 = vsel %vm817_vm10, %v989_v49, %v953_v25  ;;  %v971_v54 = vpop.permute.xlu1 %970 }
 0x309   :  { %v993_v50 = vsel %vm865_vm11, %v991_v48, %v956_v43 }
 0x30a   :  { %v996_v51 = vsel %vm994_vm13, %v993_v50, %v959_v26  ;;  %v968_v17 = vpop.permute.xlu0 %967 }
 0x30b   :  { %v999_v18 = vsel %vm997_vm14, %v996_v51, %v962_v60 }
 0x30c   :  { %v1002_v53 = vsel %vm1000_vm15, %v999_v18, %v965_v45 }
 0x30d   :  { %v1005_v56 = vsel %vm1003_vm0, %v1002_v53, %v968_v17 }
 0x30e   :  { %v1008_v16 = vsel %vm1006_vm1, %v1005_v56, %v971_v54  ;;  %v974_v57 = vpop.permute.xlu0 %973 }
 0x30f   :  { %v1011_v58 = vsel %vm1009_vm2, %v1008_v16, %v974_v57 }
 0x310   :  { %1381 = vmatmul.mubr.bf16.vlgmr.msra.gmra.mrb[4].mxu1 %v1011_v58 }
 0x311   :  { %1385 = vmatpush3.bf16.msra.mxu1 %v1449_v15  ;;  %1388 = vmatprep.mubr.msk.bf16.mxu1 %vm1488_vm12, %v1484_v55 }
 0x312   :  { %1386 = vmatprep.subr.bf16.mxu1 %v1484_v55  ;;  %v1264_v55 = vld [vmem:[%s2036_s9] ss:$0 sm:$0xff] }
 0x315   :  { %1387 = vmatpush3.bf16.msra.mxu1 %v1450_v27 }
 0x3e3   :  { %v1118_v9 = vpop.f32.mrb[4].mxu1 }
 0x3e4   :  { %v1119_v10 = vadd.f32 %v1255_v29, %v1118_v9  ;;  %v1382_v30 = vpop.f32.mrb[5].mxu1 }
 0x3e5   :  { %v1121_v7 = vpop.f32.mrb[6].mxu1 }
 0x3e6   :  { %v1124_v31 = vmax.f32 %v1119_v10, 0.0  ;;  %v1383_v8 = vpop.f32.mrb[7].mxu1 }
 0x3e8   :  { %v1125_v32 = vpack.c.bf16 %v1124_v31, %v1124_v31 }
 0x3ea   :  { %1389 = vmatmul.mubr.msk.bf16.vlgmr.msra.gmra.mrb[8].mxu1 %vm797_vm6, %v1125_v32 }
 0x4bd   :  { %v1186_v1 = vpop.f32.mrb[8].mxu1 }
 0x4be   :  { %v1187_v2 = vadd.f32 %v1264_v55, %v1186_v1  ;;  %v1390_v63 = vpop.f32.mrb[9].mxu1 }
 0x4bf   :  { %v1189_v0 = vpop.f32.mrb[10].mxu1 }
 0x4c0   :  { %1192 = vst [vmem:[#allocation2] sm:$0x3] %v1187_v2  ;;  %v1391_v33 = vpop.f32.mrb[11].mxu1 }
 0x4c1   :  { %1462 = shalt.err (!%p1459_p4)
}
 0x4c2   :  { %s1463_s9 = scalar_lea.hbm %s2037_s10, 32 }
 0x4c3   :  { %p1464_p5 = scmp.ne.s32.totalorder %s2037_s10, %s1463_s9  ;;  %p1467_p6 = scmp.lt.u32.totalorder %s1463_s9, %s2037_s10 }
 0x4c5   :  { %p1469_p7 = pnand %p1467_p6, %p1464_p5 }
 0x4c7   :  { %1472 = shalt.err (!%p1469_p7)
}
 0x4c8   :  { %1202 = dma.vmem_to_hbm [thread:$0]  %s1200_s8, 32, %s2037_s10, [#allocation3]  }
 0x4c9   :  { %1473 = dma.done.wait [#allocation3], 32  }
 0x4ca   :  { %1474 = vsyncadd [#allocation3], 4294967264 }
 0x4cb   :  { %1206 = vsyncpa [#allocation3], 1 }

</bundles_post_ra>
